<compile_context>
chip_gen: v6e
topology: v6e:2x2x1
jax: 0.10.0
libtpu: 0.0.40
codegen_flags: <defaults>
</compile_context>

<pallas_src>
import jax
import jax.numpy as jnp
from jax.experimental import pallas as pl
from jax.experimental.pallas import tpu as pltpu

LN_EPS = 1e-5          # torch.nn.LayerNorm default
LEAKY_SLOPE = 0.01     # torch.nn.LeakyReLU default
HIDDEN = 64
NUM_CLASSES = 10
LANE = 128
NEG_BIG = -1e30        # padded-logit bias -> exp underflows to exactly 0


def _round_up(n, m):
    return ((n + m - 1) // m) * m


def _layernorm(h, gamma, beta):
    mu = jnp.mean(h, axis=-1, keepdims=True)
    c = h - mu
    var = jnp.mean(c * c, axis=-1, keepdims=True)
    return c * jax.lax.rsqrt(var + LN_EPS) * gamma + beta


def _leaky_relu(h):
    return jnp.maximum(h, LEAKY_SLOPE * h)


def mlp_softmax_kernel(x_ref, pk_ref, w2_ref, w3_ref, o_ref):
    x = x_ref[...]                     # (TM, 1)
    pk = pk_ref[...]                   # (8, 128) packed small params

    b1 = pk[0:1, 0:HIDDEN]
    g1 = pk[1:2, 0:HIDDEN]
    be1 = pk[2:3, 0:HIDDEN]
    b2 = pk[3:4, 0:HIDDEN]
    g2 = pk[4:5, 0:HIDDEN]
    be2 = pk[5:6, 0:HIDDEN]
    b3p = pk[6:7, :]                   # (1, 128), cols >= 10 hold NEG_BIG
    w1 = pk[7:8, 0:HIDDEN]             # (1, 64)

    # --- Linear(1, 64): K == 1 -> pure VPU broadcast (no degenerate MXU tile)
    h = x * w1 + b1                                              # (TM, 64)
    h = _leaky_relu(_layernorm(h, g1, be1))

    # --- Linear(64, 64) + LayerNorm + LeakyReLU -----------------------------
    h = jnp.dot(h, w2_ref[...], preferred_element_type=jnp.float32) + b2
    h = _leaky_relu(_layernorm(h, g2, be2))

    # --- Linear(64, 128-padded) + softmax (padded cols contribute exactly 0)
    logits = jnp.dot(h, w3_ref[...], preferred_element_type=jnp.float32) + b3p
    logits = logits - jnp.max(logits, axis=-1, keepdims=True)
    e = jnp.exp(logits)                                          # (TM, 128)
    probs = e * pl.reciprocal(jnp.sum(e, axis=-1, keepdims=True), approx=False)
    # Only the 10 real class columns go back to HBM (masked vst, lane-padded
    # VMEM block but 8-12x less HBM writeback than the old 128-wide slab).
    o_ref[...] = probs[:, :NUM_CLASSES]


def _pack_params(p):
    """Pack (1,64)/(1,10) vectors into one (8,128) slab; pad W3 to 128 lanes."""
    pk = jnp.zeros((8, LANE), jnp.float32)
    pk = pk.at[0, :HIDDEN].set(p["b1"].reshape(HIDDEN))
    pk = pk.at[1, :HIDDEN].set(p["g1"].reshape(HIDDEN))
    pk = pk.at[2, :HIDDEN].set(p["be1"].reshape(HIDDEN))
    pk = pk.at[3, :HIDDEN].set(p["b2"].reshape(HIDDEN))
    pk = pk.at[4, :HIDDEN].set(p["g2"].reshape(HIDDEN))
    pk = pk.at[5, :HIDDEN].set(p["be2"].reshape(HIDDEN))
    b3p = jnp.full((LANE,), NEG_BIG, jnp.float32).at[:NUM_CLASSES].set(
        p["b3"].reshape(NUM_CLASSES))
    pk = pk.at[6].set(b3p)
    pk = pk.at[7, :HIDDEN].set(p["w1"].reshape(HIDDEN))
    w3p = jnp.zeros((HIDDEN, LANE), jnp.float32).at[:, :NUM_CLASSES].set(p["w3"])
    return pk, w3p


def test1_forward(x, params, *, max_tile=4096):
    """x: (B, 1) float32 -> (B, 10) float32 softmax probabilities."""
    B = x.shape[0]
    Bp = _round_up(B, 8)                       # pad batch only to sublane mult.
    if Bp != B:
        x = jnp.pad(x, ((0, Bp - B), (0, 0)))

    # Row tile: as large as possible (kernel is grid-overhead / HBM bound),
    # but keep ~4 grid steps when the batch allows so both v7x TensorCores
    # get work via the "parallel" axis.  Ragged last block is fine: all ops
    # are row-local and out-of-bounds writes are clipped.
    TM = min(max_tile, max(8, _round_up(pl.cdiv(Bp, 4), 8)))
    grid = pl.cdiv(Bp, TM)

    pk, w3p = _pack_params(params)

    out = pl.pallas_call(
        mlp_softmax_kernel,
        out_shape=jax.ShapeDtypeStruct((Bp, NUM_CLASSES), jnp.float32),
        grid=(grid,),
        in_specs=[
            pl.BlockSpec((TM, 1), lambda i: (i, 0)),           # x rows stream
            pl.BlockSpec((8, LANE), lambda i: (0, 0)),         # packed params
            pl.BlockSpec((HIDDEN, HIDDEN), lambda i: (0, 0)),  # W2 resident
            pl.BlockSpec((HIDDEN, LANE), lambda i: (0, 0)),    # W3 resident
        ],
        out_specs=pl.BlockSpec((TM, NUM_CLASSES), lambda i: (i, 0)),
        compiler_params=pltpu.CompilerParams(
            dimension_semantics=("parallel",),
            vmem_limit_bytes=32 * 1024 * 1024,
        ),
    )(x, pk, params["w2"], w3p)

    return out[:B]


def init_params(key):
    """Deterministic, PyTorch-like (uniform fan-in) init. Weights stored (in, out)."""
    def linear(key, fan_in, fan_out):
        kw, kb = jax.random.split(key)
        bound = 1.0 / jnp.sqrt(jnp.maximum(fan_in, 1)).astype(jnp.float32)
        w = jax.random.uniform(kw, (fan_in, fan_out), jnp.float32, -bound, bound)
        b = jax.random.uniform(kb, (1, fan_out), jnp.float32, -bound, bound)
        return w, b

    k1, k2, k3 = jax.random.split(key, 3)
    w1, b1 = linear(k1, 1, HIDDEN)
    w2, b2 = linear(k2, HIDDEN, HIDDEN)
    w3, b3 = linear(k3, HIDDEN, NUM_CLASSES)
    return {
        "w1": w1, "b1": b1,
        "g1": jnp.ones((1, HIDDEN), jnp.float32),
        "be1": jnp.zeros((1, HIDDEN), jnp.float32),
        "w2": w2, "b2": b2,
        "g2": jnp.ones((1, HIDDEN), jnp.float32),
        "be2": jnp.zeros((1, HIDDEN), jnp.float32),
        "w3": w3, "b3": b3,
    }


def _reference(x, p):
    h = x @ p["w1"] + p["b1"]
    mu = h.mean(-1, keepdims=True); v = ((h - mu) ** 2).mean(-1, keepdims=True)
    h = (h - mu) / jnp.sqrt(v + LN_EPS) * p["g1"] + p["be1"]
    h = jnp.where(h >= 0, h, LEAKY_SLOPE * h)
    h = h @ p["w2"] + p["b2"]
    mu = h.mean(-1, keepdims=True); v = ((h - mu) ** 2).mean(-1, keepdims=True)
    h = (h - mu) / jnp.sqrt(v + LN_EPS) * p["g2"] + p["be2"]
    h = jnp.where(h >= 0, h, LEAKY_SLOPE * h)
    logits = h @ p["w3"] + p["b3"]
    return jax.nn.softmax(logits, axis=-1)


if __name__ == "__main__":
    key = jax.random.PRNGKey(0)
    kx, kx2, kx3, kp = jax.random.split(key, 4)
    params = init_params(kp)

    # Primary small case (single grid step, TM == 8).
    B = 8
    x = jax.random.normal(kx, (B, 1), jnp.float32)
    out = jax.block_until_ready(test1_forward(x, params))
    ref = _reference(x, params)
    assert out.shape == (B, NUM_CLASSES)
    assert jnp.allclose(jnp.sum(out, axis=-1), 1.0, atol=1e-5)
    assert jnp.allclose(out, ref, atol=1e-5, rtol=1e-5)

    # Non-multiple batch: exercises the pad-to-8 + ragged-last-block path.
    B2 = 37
    x2 = jax.random.normal(kx2, (B2, 1), jnp.float32)
    out2 = jax.block_until_ready(test1_forward(x2, params))
    ref2 = _reference(x2, params)
    assert out2.shape == (B2, NUM_CLASSES)
    assert jnp.allclose(out2, ref2, atol=1e-5, rtol=1e-5)

    # Mid-size batch: exercises TM cap (~4 grid steps) + ragged last block.
    B3 = 300
    x3 = jax.random.normal(kx3, (B3, 1), jnp.float32)
    out3 = jax.block_until_ready(test1_forward(x3, params))
    ref3 = _reference(x3, params)
    assert out3.shape == (B3, NUM_CLASSES)
    assert jnp.allclose(out3, ref3, atol=1e-5, rtol=1e-5)

    print("KERNEL_OK")
</pallas_src>

<mosaic_0001>
module attributes {stable_mosaic.version = 11 : i64} {
  func.func @mlp_softmax_kernel(%arg0: i32, %arg1: memref<8x1xf32, #tpu.memory_space<vmem>>, %arg2: memref<8x128xf32, #tpu.memory_space<vmem>>, %arg3: memref<64x64xf32, #tpu.memory_space<vmem>>, %arg4: memref<64x128xf32, #tpu.memory_space<vmem>>, %arg5: memref<8x10xf32, #tpu.memory_space<vmem>>) attributes {dimension_semantics = [#tpu.dimension_semantics<parallel>], iteration_bounds = array<i64: 1>, scalar_prefetch = 0 : i64, scratch_operands = 0 : i64, tpu.core_type = #tpu.core_type<tc>, window_params = [{transform_indices = @transform_0, window_bounds = array<i64: 8, 1>}, {pipeline_mode = #tpu.pipeline_mode<synchronous>, transform_indices = @transform_1, window_bounds = array<i64: 8, 128>}, {pipeline_mode = #tpu.pipeline_mode<synchronous>, transform_indices = @transform_2, window_bounds = array<i64: 64, 64>}, {pipeline_mode = #tpu.pipeline_mode<synchronous>, transform_indices = @transform_3, window_bounds = array<i64: 64, 128>}, {transform_indices = @transform_4, window_bounds = array<i64: 8, 10>}]} {
    %c0 = arith.constant 0 : index
    %c0_0 = arith.constant 0 : index
    %0 = vector.load %arg1[%c0, %c0_0] : memref<8x1xf32, #tpu.memory_space<vmem>>, vector<8x1xf32>
    %c0_1 = arith.constant 0 : index
    %c0_2 = arith.constant 0 : index
    %1 = vector.load %arg2[%c0_1, %c0_2] : memref<8x128xf32, #tpu.memory_space<vmem>>, vector<8x128xf32>
    %2 = vector.extract_strided_slice %1 {offsets = [0, 0], sizes = [1, 64], strides = [1, 1]} : vector<8x128xf32> to vector<1x64xf32>
    %3 = vector.extract_strided_slice %1 {offsets = [1, 0], sizes = [1, 64], strides = [1, 1]} : vector<8x128xf32> to vector<1x64xf32>
    %4 = vector.extract_strided_slice %1 {offsets = [2, 0], sizes = [1, 64], strides = [1, 1]} : vector<8x128xf32> to vector<1x64xf32>
    %5 = vector.extract_strided_slice %1 {offsets = [3, 0], sizes = [1, 64], strides = [1, 1]} : vector<8x128xf32> to vector<1x64xf32>
    %6 = vector.extract_strided_slice %1 {offsets = [4, 0], sizes = [1, 64], strides = [1, 1]} : vector<8x128xf32> to vector<1x64xf32>
    %7 = vector.extract_strided_slice %1 {offsets = [5, 0], sizes = [1, 64], strides = [1, 1]} : vector<8x128xf32> to vector<1x64xf32>
    %8 = vector.extract_strided_slice %1 {offsets = [6, 0], sizes = [1, 128], strides = [1, 1]} : vector<8x128xf32> to vector<1x128xf32>
    %9 = vector.extract_strided_slice %1 {offsets = [7, 0], sizes = [1, 64], strides = [1, 1]} : vector<8x128xf32> to vector<1x64xf32>
    %10 = vector.broadcast %0 : vector<8x1xf32> to vector<8x64xf32>
    %11 = vector.broadcast %9 : vector<1x64xf32> to vector<8x64xf32>
    %12 = arith.mulf %10, %11 : vector<8x64xf32>
    %13 = vector.broadcast %2 : vector<1x64xf32> to vector<8x64xf32>
    %14 = arith.addf %12, %13 : vector<8x64xf32>
    %cst = arith.constant dense<0.000000e+00> : vector<8xf32>
    %15 = vector.multi_reduction <add>, %14, %cst [1] : vector<8x64xf32> to vector<8xf32>
    %16 = vector.shape_cast %15 : vector<8xf32> to vector<8x1xf32>
    %cst_3 = arith.constant 6.400000e+01 : f32
    %17 = vector.broadcast %cst_3 : f32 to vector<8x1xf32>
    %18 = arith.divf %16, %17 : vector<8x1xf32>
    %19 = vector.broadcast %18 : vector<8x1xf32> to vector<8x64xf32>
    %20 = arith.subf %14, %19 : vector<8x64xf32>
    %21 = arith.mulf %20, %20 : vector<8x64xf32>
    %cst_4 = arith.constant dense<0.000000e+00> : vector<8xf32>
    %22 = vector.multi_reduction <add>, %21, %cst_4 [1] : vector<8x64xf32> to vector<8xf32>
    %23 = vector.shape_cast %22 : vector<8xf32> to vector<8x1xf32>
    %cst_5 = arith.constant 6.400000e+01 : f32
    %24 = vector.broadcast %cst_5 : f32 to vector<8x1xf32>
    %25 = arith.divf %23, %24 : vector<8x1xf32>
    %cst_6 = arith.constant 9.99999974E-6 : f32
    %26 = vector.broadcast %cst_6 : f32 to vector<8x1xf32>
    %27 = arith.addf %25, %26 : vector<8x1xf32>
    %28 = math.rsqrt %27 : vector<8x1xf32>
    %29 = vector.broadcast %28 : vector<8x1xf32> to vector<8x64xf32>
    %30 = arith.mulf %20, %29 : vector<8x64xf32>
    %31 = vector.broadcast %3 : vector<1x64xf32> to vector<8x64xf32>
    %32 = arith.mulf %30, %31 : vector<8x64xf32>
    %33 = vector.broadcast %4 : vector<1x64xf32> to vector<8x64xf32>
    %34 = arith.addf %32, %33 : vector<8x64xf32>
    %cst_7 = arith.constant 0.00999999977 : f32
    %35 = vector.broadcast %cst_7 : f32 to vector<8x64xf32>
    %36 = arith.mulf %35, %34 : vector<8x64xf32>
    %37 = arith.maximumf %34, %36 : vector<8x64xf32>
    %c0_8 = arith.constant 0 : index
    %c0_9 = arith.constant 0 : index
    %38 = vector.load %arg3[%c0_8, %c0_9] : memref<64x64xf32, #tpu.memory_space<vmem>>, vector<64x64xf32>
    %cst_10 = arith.constant dense<0.000000e+00> : vector<8x64xf32>
    %39 = tpu.matmul %37, %38, %cst_10 {dimension_numbers = #tpu.dot_dimension_numbers<[1], [0], [0], [1], [0, 0, 1, 1], [], []>} : vector<8x64xf32>, vector<64x64xf32>, vector<8x64xf32> -> vector<8x64xf32>
    %40 = vector.broadcast %5 : vector<1x64xf32> to vector<8x64xf32>
    %41 = arith.addf %39, %40 : vector<8x64xf32>
    %cst_11 = arith.constant dense<0.000000e+00> : vector<8xf32>
    %42 = vector.multi_reduction <add>, %41, %cst_11 [1] : vector<8x64xf32> to vector<8xf32>
    %43 = vector.shape_cast %42 : vector<8xf32> to vector<8x1xf32>
    %cst_12 = arith.constant 6.400000e+01 : f32
    %44 = vector.broadcast %cst_12 : f32 to vector<8x1xf32>
    %45 = arith.divf %43, %44 : vector<8x1xf32>
    %46 = vector.broadcast %45 : vector<8x1xf32> to vector<8x64xf32>
    %47 = arith.subf %41, %46 : vector<8x64xf32>
    %48 = arith.mulf %47, %47 : vector<8x64xf32>
    %cst_13 = arith.constant dense<0.000000e+00> : vector<8xf32>
    %49 = vector.multi_reduction <add>, %48, %cst_13 [1] : vector<8x64xf32> to vector<8xf32>
    %50 = vector.shape_cast %49 : vector<8xf32> to vector<8x1xf32>
    %cst_14 = arith.constant 6.400000e+01 : f32
    %51 = vector.broadcast %cst_14 : f32 to vector<8x1xf32>
    %52 = arith.divf %50, %51 : vector<8x1xf32>
    %cst_15 = arith.constant 9.99999974E-6 : f32
    %53 = vector.broadcast %cst_15 : f32 to vector<8x1xf32>
    %54 = arith.addf %52, %53 : vector<8x1xf32>
    %55 = math.rsqrt %54 : vector<8x1xf32>
    %56 = vector.broadcast %55 : vector<8x1xf32> to vector<8x64xf32>
    %57 = arith.mulf %47, %56 : vector<8x64xf32>
    %58 = vector.broadcast %6 : vector<1x64xf32> to vector<8x64xf32>
    %59 = arith.mulf %57, %58 : vector<8x64xf32>
    %60 = vector.broadcast %7 : vector<1x64xf32> to vector<8x64xf32>
    %61 = arith.addf %59, %60 : vector<8x64xf32>
    %cst_16 = arith.constant 0.00999999977 : f32
    %62 = vector.broadcast %cst_16 : f32 to vector<8x64xf32>
    %63 = arith.mulf %62, %61 : vector<8x64xf32>
    %64 = arith.maximumf %61, %63 : vector<8x64xf32>
    %c0_17 = arith.constant 0 : index
    %c0_18 = arith.constant 0 : index
    %65 = vector.load %arg4[%c0_17, %c0_18] : memref<64x128xf32, #tpu.memory_space<vmem>>, vector<64x128xf32>
    %cst_19 = arith.constant dense<0.000000e+00> : vector<8x128xf32>
    %66 = tpu.matmul %64, %65, %cst_19 {dimension_numbers = #tpu.dot_dimension_numbers<[1], [0], [0], [1], [0, 0, 1, 1], [], []>} : vector<8x64xf32>, vector<64x128xf32>, vector<8x128xf32> -> vector<8x128xf32>
    %67 = vector.broadcast %8 : vector<1x128xf32> to vector<8x128xf32>
    %68 = arith.addf %66, %67 : vector<8x128xf32>
    %cst_20 = arith.constant dense<0xFF800000> : vector<8xf32>
    %69 = vector.multi_reduction <maximumf>, %68, %cst_20 [1] : vector<8x128xf32> to vector<8xf32>
    %70 = vector.shape_cast %69 : vector<8xf32> to vector<8x1xf32>
    %71 = vector.broadcast %70 : vector<8x1xf32> to vector<8x128xf32>
    %72 = arith.subf %68, %71 : vector<8x128xf32>
    %73 = math.exp %72 : vector<8x128xf32>
    %cst_21 = arith.constant dense<0.000000e+00> : vector<8xf32>
    %74 = vector.multi_reduction <add>, %73, %cst_21 [1] : vector<8x128xf32> to vector<8xf32>
    %75 = vector.shape_cast %74 : vector<8xf32> to vector<8x1xf32>
    %76 = tpu.reciprocal %75 : vector<8x1xf32> -> vector<8x1xf32>
    %77 = vector.broadcast %76 : vector<8x1xf32> to vector<8x128xf32>
    %78 = arith.mulf %73, %77 : vector<8x128xf32>
    %79 = vector.extract_strided_slice %78 {offsets = [0, 0], sizes = [8, 10], strides = [1, 1]} : vector<8x128xf32> to vector<8x10xf32>
    %c0_22 = arith.constant 0 : index
    %c0_23 = arith.constant 0 : index
    %80 = vector.load %arg5[%c0_22, %c0_23] : memref<8x10xf32, #tpu.memory_space<vmem>>, vector<8x10xf32>
    tpu.vector_store %arg5[%c0_22, %c0_23], %79 {strides = array<i32>} : memref<8x10xf32, #tpu.memory_space<vmem>>, vector<8x10xf32>,
    return
  }
  func.func @transform_0(%arg0: i32) -> (i32, i32) {
    %c0_i32 = arith.constant 0 : i32
    %c0_i32_0 = arith.constant 0 : i32
    return %arg0, %c0_i32 : i32, i32
  }
  func.func @transform_1(%arg0: i32) -> (i32, i32) {
    %c0_i32 = arith.constant 0 : i32
    %c0_i32_0 = arith.constant 0 : i32
    %c0_i32_1 = arith.constant 0 : i32
    return %c0_i32, %c0_i32_0 : i32, i32
  }
  func.func @transform_2(%arg0: i32) -> (i32, i32) {
    %c0_i32 = arith.constant 0 : i32
    %c0_i32_0 = arith.constant 0 : i32
    %c0_i32_1 = arith.constant 0 : i32
    return %c0_i32, %c0_i32_0 : i32, i32
  }
  func.func @transform_3(%arg0: i32) -> (i32, i32) {
    %c0_i32 = arith.constant 0 : i32
    %c0_i32_0 = arith.constant 0 : i32
    %c0_i32_1 = arith.constant 0 : i32
    return %c0_i32, %c0_i32_0 : i32, i32
  }
  func.func @transform_4(%arg0: i32) -> (i32, i32) {
    %c0_i32 = arith.constant 0 : i32
    %c0_i32_0 = arith.constant 0 : i32
    return %arg0, %c0_i32 : i32, i32
  }
}

</mosaic_0001>

<bundles_post_ra>
// kernel: tpu_custom_call.1
= control target key start
LH: loop header
LB: loop body
LE: loop exit
PB: predicated region body
PF: predicated region fallthrough
CT: control target
= control target key end

     0   :  { %9 = vsyncpa [#allocation3], 0  ;;  %s545_s0 = inlined_call_operand.vmem [shape: f32[8,1], index: 0, kind: input, shape index: {}]   ;;  %s546_s1 = inlined_call_operand.vmem [shape: f32[8,128], index: 1, kind: input, shape index: {}]   ;;  %s547_s2 = inlined_call_operand.hbm [shape: f32[64,64], index: 2, kind: input, shape index: {}]   ;;  %s548_s3 = inlined_call_operand.hbm [shape: f32[64,128], index: 3, kind: input, shape index: {}]   ;;  %s549_s4 = inlined_call_operand.hbm [shape: f32[8,10], index: 4, kind: output, shape index: {}]  }
   0x1   :  { %10 = vsyncpa [#allocation6], 0 }
   0x2   :  { %11 = vsyncpa [#allocation4], 0  ;;  %s453_s15 = smov [#allocation2]  }
   0x3   :  { %s21_s16 = sshll.u32 %s453_s15, 4  ;;  %s22_s16 = int_to_ptr.vmem [resolvable:$true] %s21_s16 }
   0x4   :  { %s395_s17 = scalar_lea.vmem %s22_s16, 1024  ;;  %p400_p1 = scmp.lt.s32.totalorder %s22_s16, %s22_s16 }
   0x5   :  { %p396_p0 = scmp.ne.s32.totalorder %s22_s16, %s395_s17  ;;  %p401_p2 = scmp.lt.s32.totalorder %s395_s17, %s395_s17 }
   0x7   :  { %p402_p3 = por %p401_p2, %p400_p1 }
   0x9   :  { %p403_p4 = pnand %p402_p3, %p396_p0 }
   0xb   :  { %406 = shalt.err (!%p403_p4)
}
   0xc   :  { %s454_s18 = smov 128   ;;  %s455_s19 = smov 8  }
   0xd   :  { %27 = dma.hbm_to_vmem [thread:$0]  %s547_s2, 1024, %s22_s16, [#allocation3], %s454_s18, %s454_s18, %s455_s19  }
   0xe   :  { %s456_s22 = smov [#allocation5]  }
   0xf   :  { %s33_s23 = sshll.u32 %s456_s22, 4  ;;  %s34_s23 = int_to_ptr.vmem [resolvable:$true] %s33_s23 }
  0x10   :  { %s415_s24 = scalar_lea.vmem %s34_s23, 1024  ;;  %p420_p6 = scmp.lt.s32.totalorder %s34_s23, %s34_s23 }
  0x11   :  { %p416_p5 = scmp.ne.s32.totalorder %s34_s23, %s415_s24  ;;  %p421_p7 = scmp.lt.s32.totalorder %s415_s24, %s415_s24 }
  0x13   :  { %p422_p8 = por %p421_p7, %p420_p6 }
  0x15   :  { %p423_p9 = pnand %p422_p8, %p416_p5 }
  0x17   :  { %426 = shalt.err (!%p423_p9)
}
  0x18   :  { %39 = dma.hbm_to_vmem [thread:$0]  %s548_s3, 1024, %s34_s23, [#allocation6], %s454_s18, %s454_s18, %s455_s19  }
  0x19   :  { %447 = dma.done.wait [#allocation3], 1024  }
  0x1a   :  { %448 = vsyncadd [#allocation3], 4294966272 }
  0x1b   :  { %449 = dma.done.wait [#allocation6], 1024  }
  0x1c   :  { %450 = vsyncadd [#allocation6], 4294966272  ;;  %v457_v0 = vmov 0   ;;  %v46_v1 = vld [vmem:[%s545_s0] sm:$0xff]  ;;  %v53_v2 = vlaneseq  ;;  %vm63_vm0 = vcmask 523264   ;;  %v97_v18 = vld [vmem:[#allocation2 + $0x38] sm:$0xff] }
  0x1d   :  { %378 = vset.pattern.permute.xlu0 %v457_v0  ;;  %v501_v5 = vld [vmem:[%s546_s1] sm:$0xff]  ;;  %v458_v19 = vmov 0.0   ;;  %v96_v20 = vld [vmem:[#allocation2 + $0x30] sm:$0xff]  ;;  %vm459_vm1 = vmmov 0   ;;  %v95_v21 = vld [vmem:[#allocation2 + $0x28] sm:$0xff]  ;;  %s460_s0 = smov [#allocation7]  }
  0x1e   :  { %50 = vperm.xlu0 %378, %v46_v1   ;;  %v495_v3 = vshrl.u32 %v53_v2, 7  ;;  %332 = vmatprep.subr.mxu0 %v458_v19  ;;  %v94_v22 = vld [vmem:[#allocation2 + $0x20] sm:$0xff]  ;;  %v93_v23 = vld [vmem:[#allocation2 + $0x18] sm:$0xff]  ;;  %v92_v24 = vld [vmem:[#allocation2 + $0x10] sm:$0xff]  ;;  %s302_s1 = sshll.u32 %s460_s0, 4  ;;  %vm294_vm2 = vcmask 80896   ;;  %s303_s1 = int_to_ptr.vmem [resolvable:$true] %s302_s1 }
  0x1f   :  { %348 = vmatprep.mubr.msk.f32.mxu0 %vm459_vm1, %v458_v19  ;;  %333 = vmatpush3.msra.mxu0 %v97_v18  ;;  %v91_v25 = vld [vmem:[#allocation2 + $0x8] sm:$0xff]  ;;  %v90_v26 = vld [vmem:[#allocation2] sm:$0xff]  ;;  %v207_v51 = vld [vmem:[#allocation5 + $0x38] sm:$0xff]  ;;  %s427_s3 = scalar_lea.vmem %s303_s1, 128  ;;  %p432_p11 = scmp.lt.s32.totalorder %s303_s1, %s303_s1 }
  0x20   :  { %v55_v4 = vsub.s32 7, %v495_v3  ;;  %v60_v6 = vsub.s32 0, %v495_v3  ;;  %351 = vmatprep.subr.mxu1 %v458_v19  ;;  %334 = vmatprep.subr.mxu0 %v458_v19  ;;  %v80_v30 = vsub.s32 1, %v495_v3  ;;  %v85_v31 = vsub.s32 2, %v495_v3  ;;  %v206_v52 = vld [vmem:[#allocation5 + $0x30] sm:$0xff]  ;;  %v205_v53 = vld [vmem:[#allocation5 + $0x28] sm:$0xff]  ;;  %p428_p10 = scmp.ne.s32.totalorder %s303_s1, %s427_s3  ;;  %p433_p12 = scmp.lt.s32.totalorder %s427_s3, %s427_s3 }
  0x21   :  { %367 = vmatprep.mubr.msk.f32.mxu1 %vm459_vm1, %v458_v19  ;;  %335 = vmatpush3.msra.mxu0 %v96_v20  ;;  %v100_v40 = vsub.s32 3, %v495_v3  ;;  %v204_v54 = vld [vmem:[#allocation5 + $0x20] sm:$0xff]  ;;  %v203_v55 = vld [vmem:[#allocation5 + $0x18] sm:$0xff]  ;;  %v202_v56 = vld [vmem:[#allocation5 + $0x10] sm:$0xff]  ;;  %v190_v62 = vsub.s32 4, %v495_v3  ;;  %v195_v63 = vsub.s32 5, %v495_v3 }
  0x22   :  { %v56_v7 = vrot.slane %v501_v5, %v55_v4  ;;  %v61_v8 = vrot.slane %v501_v5, %v60_v6  ;;  %336 = vmatprep.subr.mxu0 %v458_v19  ;;  %v81_v32 = vrot.slane %v501_v5, %v80_v30  ;;  %v86_v35 = vrot.slane %v501_v5, %v85_v31  ;;  %v201_v57 = vld [vmem:[#allocation5 + $0x8] sm:$0xff]  ;;  %v200_v58 = vld [vmem:[#allocation5] sm:$0xff]  ;;  %p434_p13 = por %p433_p12, %p432_p11 }
  0x23   :  { %337 = vmatpush3.msra.mxu0 %v95_v21  ;;  %v101_v41 = vrot.slane %v501_v5, %v100_v40  ;;  %352 = vmatpush3.msra.mxu1 %v207_v51  ;;  %v191_v0 = vrot.slane %v501_v5, %v190_v62  ;;  %v196_v4 = vrot.slane %v501_v5, %v195_v63 }
  0x24   :  { %338 = vmatprep.subr.mxu0 %v458_v19  ;;  %353 = vmatprep.subr.mxu1 %v458_v19  ;;  %p435_p0 = pnand %p434_p13, %p428_p10 }
  0x25   :  { %339 = vmatpush3.msra.mxu0 %v94_v22  ;;  %354 = vmatpush3.msra.mxu1 %v206_v52 }
  0x26   :  { %340 = vmatprep.subr.mxu0 %v458_v19  ;;  %355 = vmatprep.subr.mxu1 %v458_v19 }
  0x27   :  { %341 = vmatpush3.msra.mxu0 %v93_v23  ;;  %356 = vmatpush3.msra.mxu1 %v205_v53 }
  0x28   :  { %342 = vmatprep.subr.mxu0 %v458_v19  ;;  %357 = vmatprep.subr.mxu1 %v458_v19 }
  0x29   :  { %343 = vmatpush3.msra.mxu0 %v92_v24  ;;  %358 = vmatpush3.msra.mxu1 %v204_v54 }
  0x2a   :  { %344 = vmatprep.subr.mxu0 %v458_v19  ;;  %359 = vmatprep.subr.mxu1 %v458_v19 }
  0x2b   :  { %345 = vmatpush3.msra.mxu0 %v91_v25  ;;  %360 = vmatpush3.msra.mxu1 %v203_v55 }
  0x2c   :  { %346 = vmatprep.subr.mxu0 %v458_v19  ;;  %361 = vmatprep.subr.mxu1 %v458_v19 }
  0x2d   :  { %347 = vmatpush3.msra.mxu0 %v90_v26  ;;  %362 = vmatpush3.msra.mxu1 %v202_v56 }
  0x2e   :  { %363 = vmatprep.subr.mxu1 %v458_v19 }
  0x2f   :  { %364 = vmatpush3.msra.mxu1 %v201_v57 }
  0x30   :  { %365 = vmatprep.subr.mxu1 %v458_v19 }
  0x31   :  { %366 = vmatpush3.msra.mxu1 %v200_v58 }
  0x99   :  { %v51_v9 = vpop.permute.xlu0 %50 }
  0x9a   :  { %v57_v10 = vmul.f32 %v56_v7, %v51_v9 }
  0x9c   :  { %v62_v11 = vadd.f32 %v61_v8, %v57_v10  ;;  %v210_v10 = vsub.s32 6, %v495_v3 }
  0x9e   :  { %v64_v12 = vsel %vm63_vm0, %v62_v11, 0.0 }
  0x9f   :  { %65 = vadd.xlane.f32.xlu0 %v64_v12 }
 0x128   :  { %v66_v13 = vpop.xlane.xlu0 %65 }
 0x129   :  { %v68_v14 = vmul.f32 0.015625, %v66_v13 }
 0x12b   :  { %v69_v15 = vsub.f32 %v62_v11, %v68_v14  ;;  %v211_v11 = vrot.slane %v501_v5, %v210_v10 }
 0x12d   :  { %v70_v16 = vmul.f32 %v69_v15, %v69_v15 }
 0x12f   :  { %v71_v17 = vsel %vm63_vm0, %v70_v16, 0.0 }
 0x130   :  { %72 = vadd.xlane.f32.xlu1 %v71_v17 }
 0x1b9   :  { %v73_v27 = vpop.xlane.xlu1 %72 }
 0x1ba   :  { %v74_v28 = vmul.f32 0.015625, %v73_v27 }
 0x1bc   :  { %v75_v29 = vadd.f32 1e-05, %v74_v28 }
 0x1be   :  { %379 = vrsqrt.f32 %v75_v29 }
 0x1cb   :  { %v380_v33 = vpop.eup %379 }
 0x1cc   :  { %v77_v34 = vmul.f32 %v380_v33, %v69_v15 }
 0x1ce   :  { %v82_v36 = vmul.f32 %v81_v32, %v77_v34 }
 0x1d0   :  { %v87_v37 = vadd.f32 %v86_v35, %v82_v36 }
 0x1d2   :  { %v88_v38 = vmul.f32 0.01, %v87_v37 }
 0x1d4   :  { %v89_v39 = vmax.f32 %v87_v37, %v88_v38 }
 0x1d6   :  { %349 = vmatmul.mubr.msk.f32.vlgmr.msra.gmra.mxu0 %vm63_vm0, %v89_v39 }
 0x296   :  { %v171_v42 = vpop.f32.mrf.mxu0 }
 0x297   :  { %v172_v43 = vadd.f32 %v171_v42, %v101_v41 }
 0x298   :  { %v350_v44 = vpop.f32.mrf.mxu0 }
 0x299   :  { %v175_v45 = vsel %vm63_vm0, %v172_v43, 0.0 }
 0x29a   :  { %176 = vadd.xlane.f32.xlu1 %v175_v45 }
 0x323   :  { %v177_v46 = vpop.xlane.xlu1 %176 }
 0x324   :  { %v178_v47 = vmul.f32 0.015625, %v177_v46 }
 0x326   :  { %v179_v48 = vsub.f32 %v172_v43, %v178_v47 }
 0x328   :  { %v180_v49 = vmul.f32 %v179_v48, %v179_v48 }
 0x32a   :  { %v181_v50 = vsel %vm63_vm0, %v180_v49, 0.0 }
 0x32b   :  { %182 = vadd.xlane.f32.xlu1 %v181_v50 }
 0x3b4   :  { %v183_v59 = vpop.xlane.xlu1 %182 }
 0x3b5   :  { %v184_v60 = vmul.f32 0.015625, %v183_v59 }
 0x3b7   :  { %v185_v61 = vadd.f32 1e-05, %v184_v60 }
 0x3b9   :  { %381 = vrsqrt.f32 %v185_v61 }
 0x3c6   :  { %v382_v1 = vpop.eup %381 }
 0x3c7   :  { %v187_v2 = vmul.f32 %v382_v1, %v179_v48 }
 0x3c9   :  { %v192_v6 = vmul.f32 %v191_v0, %v187_v2 }
 0x3cb   :  { %v197_v7 = vadd.f32 %v196_v4, %v192_v6 }
 0x3cd   :  { %v198_v8 = vmul.f32 0.01, %v197_v7 }
 0x3cf   :  { %v199_v9 = vmax.f32 %v197_v7, %v198_v8 }
 0x3d1   :  { %368 = vmatmul.mubr.msk.f32.vlgmr.msra.gmra.mxu1 %vm63_vm0, %v199_v9 }
 0x491   :  { %v281_v12 = vpop.f32.mrf.mxu1 }
 0x492   :  { %v282_v13 = vadd.f32 %v281_v12, %v211_v11 }
 0x493   :  { %v369_v14 = vpop.f32.mrf.mxu1 }
 0x494   :  { %285 = vmax.xlane.f32.xlu1 %v282_v13 }
 0x51d   :  { %v286_v15 = vpop.xlane.xlu1 %285 }
 0x51e   :  { %v287_v16 = vsub.f32 %v282_v13, %v286_v15 }
 0x520   :  { %v288_v17 = vmul.f32 1.442695, %v287_v16 }
 0x522   :  { %383 = vpow2.f32 %v288_v17 }
 0x52f   :  { %v384_v18 = vpop.eup %383 }
 0x530   :  { %290 = vadd.xlane.f32.xlu1 %v384_v18 }
 0x5b9   :  { %v291_v19 = vpop.xlane.xlu1 %290 }
 0x5ba   :  { %385 = vrcp.f32 %v291_v19 }
 0x5c7   :  { %v386_v20 = vpop.eup %385 }
 0x5c8   :  { %v293_v21 = vmul.f32 %v386_v20, %v384_v18 }
 0x5ca   :  { %295 = vst.msk [vmem:[#allocation7] sm:$0xff] %vm294_vm2, %v293_v21 }
 0x5cb   :  { %438 = shalt.err (!%p435_p0)
}
 0x5cc   :  { %305 = dma.vmem_to_hbm [thread:$0]  %s303_s1, 128, %s549_s4, [#allocation4]  }
 0x5cd   :  { %451 = dma.done.wait [#allocation4], 128  }
 0x5ce   :  { %452 = vsyncadd [#allocation4], 4294967168 }
 0x5cf   :  { %309 = vsyncpa [#allocation3], 1 }
 0x5d0   :  { %310 = vsyncpa [#allocation6], 1 }
 0x5d1   :  { %311 = vsyncpa [#allocation4], 1 }

</bundles_post_ra>
